<compile_context>
chip_gen: v6e
topology: v6e:2x2x1
jax: 0.10.0
libtpu: 0.0.40
codegen_flags: <defaults>
</compile_context>

<pallas_src>
import functools

import jax
import jax.numpy as jnp
from jax import lax
from jax.experimental import pallas as pl
from jax.experimental.pallas import tpu as pltpu

LEAKY_SLOPE = 0.01  # nn.LeakyReLU() default negative_slope


def _cdiv(a, b):
    return (a + b - 1) // b


def _leaky_relu(x):
    return jnp.where(x > 0, x, LEAKY_SLOPE * x)


def _output_layer_scalar_kernel(
    x_ref,    # (TN, C_in)     native row-major input tile
    w1_ref,   # (C_mid, C_in)  PyTorch (out, in) layout, mm dtype
    b1_ref,   # (C_mid, 1)     f32
    w2_ref,   # (C_mid, C_mid) mm dtype
    b2_ref,   # (C_mid, 1)     f32
    w3a_ref,  # (1, C_mid)     first half of W3, mm dtype
    w3b_ref,  # (1, C_mid)     second half of W3, mm dtype
    b3_ref,   # (1, 1)         f32
    o_ref,    # (1, TN)        lane-dense output tile
):
    mm = w1_ref.dtype                       # f32 or bf16 matmul operands
    x = x_ref[...].astype(mm)               # cast in VMEM, no extra HBM pass

    # layer 1 + LeakyReLU: contract dim 1 of W1 with dim 1 of x ->
    #   out[m, n] = sum_k W1[m, k] * x[n, k]      shape (C_mid, TN)
    # Batch stays on the lane axis; no transpose of x is materialized.
    y1 = lax.dot_general(
        w1_ref[...], x,
        dimension_numbers=(((1,), (1,)), ((), ())),
        preferred_element_type=jnp.float32)
    y1 = _leaky_relu(y1 + b1_ref[...])
    y1_mm = y1.astype(mm)

    # layer 2 + LeakyReLU: (C_mid, C_mid) @ (C_mid, TN) -> (C_mid, TN)
    y2 = jnp.dot(w2_ref[...], y1_mm, preferred_element_type=jnp.float32)
    y2 = _leaky_relu(y2 + b2_ref[...])
    y2_mm = y2.astype(mm)

    # layer 3 on cat(y1, y2): split-W3 form (no concat materialized)
    y3 = (jnp.dot(w3a_ref[...], y1_mm, preferred_element_type=jnp.float32)
          + jnp.dot(w3b_ref[...], y2_mm, preferred_element_type=jnp.float32)
          + b3_ref[...])

    o_ref[...] = y3.astype(o_ref.dtype)


@functools.partial(jax.jit, static_argnames=("tile_n", "use_bf16"))
def output_layer_scalar(x, params, *, tile_n=1024, use_bf16=True):
    """x: (N, C_in). Returns (N,) float32 scores."""
    n, c_in = x.shape
    w1, b1, w2, b2, w3, b3 = (
        params["w1"], params["b1"], params["w2"], params["b2"],
        params["w3"], params["b3"],
    )
    c_mid = w1.shape[0]

    assert tile_n % 128 == 0, "tile_n must be a multiple of 128 (lane width)"

    # Keep at least 2 grid steps when the batch allows it (v7x: 2 TensorCores
    # share the grid when the axis is 'parallel').
    if n > 128:
        tile_n = min(tile_n, max(128, _cdiv(_cdiv(n, 2), 128) * 128))
    num_tiles = _cdiv(n, tile_n)

    mm_dtype = jnp.bfloat16 if use_bf16 else jnp.float32
    w1c = w1.astype(mm_dtype)
    w2c = w2.astype(mm_dtype)
    w3a = w3[:, :c_mid].astype(mm_dtype)
    w3b = w3[:, c_mid:].astype(mm_dtype)
    b1c = b1.reshape(c_mid, 1).astype(jnp.float32)
    b2c = b2.reshape(c_mid, 1).astype(jnp.float32)
    b3c = b3.reshape(1, 1).astype(jnp.float32)

    const = lambda i: (0, 0)  # weights / biases resident across the grid

    flops = 2 * n * (c_mid * c_in + c_mid * c_mid + 2 * c_mid)
    w_bytes = (c_mid * c_in + c_mid * c_mid + 2 * c_mid) * jnp.dtype(mm_dtype).itemsize
    bytes_accessed = (n * c_in * x.dtype.itemsize   # x read
                      + n * 4                       # output write
                      + w_bytes
                      + (2 * c_mid + 1) * 4)        # f32 biases

    out = pl.pallas_call(
        _output_layer_scalar_kernel,
        out_shape=jax.ShapeDtypeStruct((1, n), jnp.float32),
        grid_spec=pltpu.PrefetchScalarGridSpec(
            num_scalar_prefetch=0,
            grid=(num_tiles,),
            in_specs=[
                pl.BlockSpec((tile_n, c_in), lambda i: (i, 0)),
                pl.BlockSpec((c_mid, c_in), const),
                pl.BlockSpec((c_mid, 1), const),
                pl.BlockSpec((c_mid, c_mid), const),
                pl.BlockSpec((c_mid, 1), const),
                pl.BlockSpec((1, c_mid), const),
                pl.BlockSpec((1, c_mid), const),
                pl.BlockSpec((1, 1), const),
            ],
            out_specs=pl.BlockSpec((1, tile_n), lambda i: (0, i)),
        ),
        compiler_params=pltpu.CompilerParams(
            dimension_semantics=("parallel",),  # shards across v7x's 2 TCs
        ),
        cost_estimate=pl.CostEstimate(
            flops=flops, transcendentals=0, bytes_accessed=bytes_accessed),
    )(x, w1c, b1c, w2c, b2c, w3a, w3b, b3c)

    return out.reshape(n)


def init_params(key, channels_in, channels_mid):
    """Synthetic init matching PyTorch Linear shapes (weight: (out,in))."""
    k1, k2, k3, k4, k5, k6 = jax.random.split(key, 6)
    s1 = 1.0 / jnp.sqrt(channels_in)
    s2 = 1.0 / jnp.sqrt(channels_mid)
    s3 = 1.0 / jnp.sqrt(2 * channels_mid)
    return {
        "w1": jax.random.uniform(k1, (channels_mid, channels_in), jnp.float32, -s1, s1),
        "b1": jax.random.uniform(k2, (channels_mid,), jnp.float32, -s1, s1),
        "w2": jax.random.uniform(k3, (channels_mid, channels_mid), jnp.float32, -s2, s2),
        "b2": jax.random.uniform(k4, (channels_mid,), jnp.float32, -s2, s2),
        "w3": jax.random.uniform(k5, (1, 2 * channels_mid), jnp.float32, -s3, s3),
        "b3": jax.random.uniform(k6, (1,), jnp.float32, -s3, s3),
    }


def _reference(x, params):
    """Plain-JAX f32 reference of the PyTorch forward for validation."""
    y1 = _leaky_relu(x @ params["w1"].T + params["b1"])
    y2 = _leaky_relu(y1 @ params["w2"].T + params["b2"])
    y3 = jnp.concatenate([y1, y2], axis=1) @ params["w3"].T + params["b3"]
    return y3.reshape(x.shape[0])


if __name__ == "__main__":
    key = jax.random.PRNGKey(0)
    channels_in, channels_mid = 32, 64
    length = 300  # deliberately NOT a multiple of the tile -> partial block path

    kx, kp = jax.random.split(key)
    x = jax.random.normal(kx, (length, channels_in), dtype=jnp.float32)
    params = init_params(kp, channels_in, channels_mid)

    y_ref = _reference(x, params)

    # Default path: bf16 matmul operands, f32 accumulation (loose tolerance).
    y_bf16 = jax.block_until_ready(output_layer_scalar(x, params))
    assert y_bf16.shape == (length,)
    assert jnp.allclose(y_bf16, y_ref, atol=5e-2, rtol=5e-2), (
        f"bf16 mismatch: max abs err {jnp.max(jnp.abs(y_bf16 - y_ref))}"
    )

    # f32 path: bit-tight semantic check against the reference.
    y_f32 = jax.block_until_ready(output_layer_scalar(x, params, use_bf16=False))
    assert y_f32.shape == (length,)
    assert jnp.allclose(y_f32, y_ref, atol=1e-4, rtol=1e-4), (
        f"f32 mismatch: max abs err {jnp.max(jnp.abs(y_f32 - y_ref))}"
    )

    print("KERNEL_OK")
</pallas_src>

<mosaic_0001>
module attributes {stable_mosaic.version = 11 : i64} {
  func.func @_output_layer_scalar_kernel(%arg0: i32, %arg1: memref<256x32xf32, #tpu.memory_space<vmem>>, %arg2: memref<64x32xbf16, #tpu.memory_space<vmem>>, %arg3: memref<64x1xf32, #tpu.memory_space<vmem>>, %arg4: memref<64x64xbf16, #tpu.memory_space<vmem>>, %arg5: memref<64x1xf32, #tpu.memory_space<vmem>>, %arg6: memref<1x64xbf16, #tpu.memory_space<vmem>>, %arg7: memref<1x64xbf16, #tpu.memory_space<vmem>>, %arg8: memref<1x1xf32, #tpu.memory_space<vmem>>, %arg9: memref<1x256xf32, #tpu.memory_space<vmem>>) attributes {dimension_semantics = [#tpu.dimension_semantics<parallel>], iteration_bounds = array<i64: 2>, scalar_prefetch = 0 : i64, scratch_operands = 0 : i64, tpu.core_type = #tpu.core_type<tc>, window_params = [{transform_indices = @transform_0, window_bounds = array<i64: 256, 32>}, {pipeline_mode = #tpu.pipeline_mode<synchronous>, transform_indices = @transform_1, window_bounds = array<i64: 64, 32>}, {pipeline_mode = #tpu.pipeline_mode<synchronous>, transform_indices = @transform_2, window_bounds = array<i64: 64, 1>}, {pipeline_mode = #tpu.pipeline_mode<synchronous>, transform_indices = @transform_3, window_bounds = array<i64: 64, 64>}, {pipeline_mode = #tpu.pipeline_mode<synchronous>, transform_indices = @transform_4, window_bounds = array<i64: 64, 1>}, {pipeline_mode = #tpu.pipeline_mode<synchronous>, transform_indices = @transform_5, window_bounds = array<i64: 1, 64>}, {pipeline_mode = #tpu.pipeline_mode<synchronous>, transform_indices = @transform_6, window_bounds = array<i64: 1, 64>}, {pipeline_mode = #tpu.pipeline_mode<synchronous>, transform_indices = @transform_7, window_bounds = array<i64: 1, 1>}, {transform_indices = @transform_8, window_bounds = array<i64: 1, 256>}]} {
    %c0 = arith.constant 0 : index
    %c0_0 = arith.constant 0 : index
    %0 = vector.load %arg1[%c0, %c0_0] : memref<256x32xf32, #tpu.memory_space<vmem>>, vector<256x32xf32>
    %1 = arith.truncf %0 : vector<256x32xf32> to vector<256x32xbf16>
    %c0_1 = arith.constant 0 : index
    %c0_2 = arith.constant 0 : index
    %2 = vector.load %arg2[%c0_1, %c0_2] : memref<64x32xbf16, #tpu.memory_space<vmem>>, vector<64x32xbf16>
    %cst = arith.constant dense<0.000000e+00> : vector<64x256xf32>
    %3 = tpu.matmul %2, %1, %cst {dimension_numbers = #tpu.dot_dimension_numbers<[1], [1], [0], [0], [0, 0, 1, 0], [], []>} : vector<64x32xbf16>, vector<256x32xbf16>, vector<64x256xf32> -> vector<64x256xf32>
    %c0_3 = arith.constant 0 : index
    %c0_4 = arith.constant 0 : index
    %4 = vector.load %arg3[%c0_3, %c0_4] : memref<64x1xf32, #tpu.memory_space<vmem>>, vector<64x1xf32>
    %5 = vector.broadcast %4 : vector<64x1xf32> to vector<64x256xf32>
    %6 = arith.addf %3, %5 : vector<64x256xf32>
    %cst_5 = arith.constant 0.000000e+00 : f32
    %7 = vector.broadcast %cst_5 : f32 to vector<64x256xf32>
    %8 = arith.cmpf ogt, %6, %7 : vector<64x256xf32>
    %cst_6 = arith.constant 0.00999999977 : f32
    %9 = vector.broadcast %cst_6 : f32 to vector<64x256xf32>
    %10 = arith.mulf %9, %6 : vector<64x256xf32>
    %11 = arith.select %8, %6, %10 : vector<64x256xi1>, vector<64x256xf32>
    %12 = arith.truncf %11 : vector<64x256xf32> to vector<64x256xbf16>
    %c0_7 = arith.constant 0 : index
    %c0_8 = arith.constant 0 : index
    %13 = vector.load %arg4[%c0_7, %c0_8] : memref<64x64xbf16, #tpu.memory_space<vmem>>, vector<64x64xbf16>
    %cst_9 = arith.constant dense<0.000000e+00> : vector<64x256xf32>
    %14 = tpu.matmul %13, %12, %cst_9 {dimension_numbers = #tpu.dot_dimension_numbers<[1], [0], [0], [1], [0, 0, 1, 1], [], []>} : vector<64x64xbf16>, vector<64x256xbf16>, vector<64x256xf32> -> vector<64x256xf32>
    %c0_10 = arith.constant 0 : index
    %c0_11 = arith.constant 0 : index
    %15 = vector.load %arg5[%c0_10, %c0_11] : memref<64x1xf32, #tpu.memory_space<vmem>>, vector<64x1xf32>
    %16 = vector.broadcast %15 : vector<64x1xf32> to vector<64x256xf32>
    %17 = arith.addf %14, %16 : vector<64x256xf32>
    %cst_12 = arith.constant 0.000000e+00 : f32
    %18 = vector.broadcast %cst_12 : f32 to vector<64x256xf32>
    %19 = arith.cmpf ogt, %17, %18 : vector<64x256xf32>
    %cst_13 = arith.constant 0.00999999977 : f32
    %20 = vector.broadcast %cst_13 : f32 to vector<64x256xf32>
    %21 = arith.mulf %20, %17 : vector<64x256xf32>
    %22 = arith.select %19, %17, %21 : vector<64x256xi1>, vector<64x256xf32>
    %23 = arith.truncf %22 : vector<64x256xf32> to vector<64x256xbf16>
    %c0_14 = arith.constant 0 : index
    %c0_15 = arith.constant 0 : index
    %24 = vector.load %arg6[%c0_14, %c0_15] : memref<1x64xbf16, #tpu.memory_space<vmem>>, vector<1x64xbf16>
    %cst_16 = arith.constant dense<0.000000e+00> : vector<1x256xf32>
    %25 = tpu.matmul %24, %12, %cst_16 {dimension_numbers = #tpu.dot_dimension_numbers<[1], [0], [0], [1], [0, 0, 1, 1], [], []>} : vector<1x64xbf16>, vector<64x256xbf16>, vector<1x256xf32> -> vector<1x256xf32>
    %c0_17 = arith.constant 0 : index
    %c0_18 = arith.constant 0 : index
    %26 = vector.load %arg7[%c0_17, %c0_18] : memref<1x64xbf16, #tpu.memory_space<vmem>>, vector<1x64xbf16>
    %cst_19 = arith.constant dense<0.000000e+00> : vector<1x256xf32>
    %27 = tpu.matmul %26, %23, %cst_19 {dimension_numbers = #tpu.dot_dimension_numbers<[1], [0], [0], [1], [0, 0, 1, 1], [], []>} : vector<1x64xbf16>, vector<64x256xbf16>, vector<1x256xf32> -> vector<1x256xf32>
    %28 = arith.addf %25, %27 : vector<1x256xf32>
    %c0_20 = arith.constant 0 : index
    %c0_21 = arith.constant 0 : index
    %29 = vector.load %arg8[%c0_20, %c0_21] : memref<1x1xf32, #tpu.memory_space<vmem>>, vector<1x1xf32>
    %30 = vector.broadcast %29 : vector<1x1xf32> to vector<1x256xf32>
    %31 = arith.addf %28, %30 : vector<1x256xf32>
    %c0_22 = arith.constant 0 : index
    %c0_23 = arith.constant 0 : index
    %32 = vector.load %arg9[%c0_22, %c0_23] : memref<1x256xf32, #tpu.memory_space<vmem>>, vector<1x256xf32>
    tpu.vector_store %arg9[%c0_22, %c0_23], %31 {strides = array<i32>} : memref<1x256xf32, #tpu.memory_space<vmem>>, vector<1x256xf32>,
    return
  }
  func.func @transform_0(%arg0: i32) -> (i32, i32) {
    %c0_i32 = arith.constant 0 : i32
    %c0_i32_0 = arith.constant 0 : i32
    return %arg0, %c0_i32 : i32, i32
  }
  func.func @transform_1(%arg0: i32) -> (i32, i32) {
    %c0_i32 = arith.constant 0 : i32
    %c0_i32_0 = arith.constant 0 : i32
    %c0_i32_1 = arith.constant 0 : i32
    return %c0_i32, %c0_i32_0 : i32, i32
  }
  func.func @transform_2(%arg0: i32) -> (i32, i32) {
    %c0_i32 = arith.constant 0 : i32
    %c0_i32_0 = arith.constant 0 : i32
    %c0_i32_1 = arith.constant 0 : i32
    return %c0_i32, %c0_i32_0 : i32, i32
  }
  func.func @transform_3(%arg0: i32) -> (i32, i32) {
    %c0_i32 = arith.constant 0 : i32
    %c0_i32_0 = arith.constant 0 : i32
    %c0_i32_1 = arith.constant 0 : i32
    return %c0_i32, %c0_i32_0 : i32, i32
  }
  func.func @transform_4(%arg0: i32) -> (i32, i32) {
    %c0_i32 = arith.constant 0 : i32
    %c0_i32_0 = arith.constant 0 : i32
    %c0_i32_1 = arith.constant 0 : i32
    return %c0_i32, %c0_i32_0 : i32, i32
  }
  func.func @transform_5(%arg0: i32) -> (i32, i32) {
    %c0_i32 = arith.constant 0 : i32
    %c0_i32_0 = arith.constant 0 : i32
    %c0_i32_1 = arith.constant 0 : i32
    return %c0_i32, %c0_i32_0 : i32, i32
  }
  func.func @transform_6(%arg0: i32) -> (i32, i32) {
    %c0_i32 = arith.constant 0 : i32
    %c0_i32_0 = arith.constant 0 : i32
    %c0_i32_1 = arith.constant 0 : i32
    return %c0_i32, %c0_i32_0 : i32, i32
  }
  func.func @transform_7(%arg0: i32) -> (i32, i32) {
    %c0_i32 = arith.constant 0 : i32
    %c0_i32_0 = arith.constant 0 : i32
    %c0_i32_1 = arith.constant 0 : i32
    return %c0_i32, %c0_i32_0 : i32, i32
  }
  func.func @transform_8(%arg0: i32) -> (i32, i32) {
    %c0_i32 = arith.constant 0 : i32
    %c0_i32_0 = arith.constant 0 : i32
    return %c0_i32, %arg0 : i32, i32
  }
}

</mosaic_0001>

<bundles_post_ra>
// kernel: output_layer_scalar.1
= control target key start
LH: loop header
LB: loop body
LE: loop exit
PB: predicated region body
PF: predicated region fallthrough
CT: control target
= control target key end

     0   :  { %s2693_s0 = inlined_call_operand.vmem [shape: f32[300,32], index: 0, kind: input, shape index: {}]   ;;  %s2694_s1 = inlined_call_operand.vmem [shape: bf16[64,32], index: 1, kind: input, shape index: {}]   ;;  %s2695_s2 = inlined_call_operand.vmem [shape: f32[64,1], index: 2, kind: input, shape index: {}]   ;;  %s2696_s3 = inlined_call_operand.vmem [shape: bf16[64,64], index: 3, kind: input, shape index: {}]   ;;  %s2697_s4 = inlined_call_operand.vmem [shape: f32[64,1], index: 4, kind: input, shape index: {}]   ;;  %s2698_s5 = inlined_call_operand.vmem [shape: bf16[1,64], index: 5, kind: input, shape index: {}]   ;;  %s2699_s6 = inlined_call_operand.vmem [shape: bf16[1,64], index: 6, kind: input, shape index: {}]   ;;  %s2700_s7 = inlined_call_operand.<no memory space> [shape: f32[1,1], index: 7, kind: input, shape index: {}]   ;;  %s2701_s8 = inlined_call_operand.vmem [shape: f32[1,300], index: 8, kind: output, shape index: {}]  }
   0x1   :  { %v13_v0 = vstv %s2700_s7 }
   0x2   :  { %14 = vst [vmem:[#allocation2] sm:$0x1] %v13_v0 }
   0x3   :  { %s1996_s29 = smov 0   ;;  %s1998_s30 = smov 0  }
   0x4   :  { %s2000_s9 = smov 0  }
   0x5 LB: > { %s2009_s7 = sadd.s32 4294967295, %s1878_s9   ;;  %s2011_s10 = sadd.s32 1, %s1878_s9   ;;  %s1878_s9 = sphi %s2000_s9, %s2716_s9   ;;  %s1874_s30 = sphi %s1998_s30, %s2715_s30   ;;  %s1870_s29 = sphi %s1996_s29, %s2714_s29  }
   0x6   : > { %s197_s11 = ssub.s32 %s1878_s9, %s2011_s10  ;;  %s200_s12 = sadd.s32 1, %s1874_s30 }
   0x7   : > { %p198_p0 = scmp.eq.s32.totalorder %s197_s11, 0  ;;  %p210_p1 = scmp.ne.s32.totalorder %s1874_s30, %s1870_s29 }
   0x8   : > { %p211_p2 = scmp.eq.s32.totalorder %s2009_s7, 1  ;;  %p1539_p3 = scmp.ge.s32.totalorder %s1878_s9, 1 }
   0x9   : > { %s2019_s13 = scalar_select %p198_p0, %s1874_s30, %s200_s12  }
   0xa   : > { %p2021_p4 = por %p211_p2, %p210_p1  ;;  %p273_p5 = scmp.lt.s32.totalorder %s1878_s9, 3 }
   0xc   : > { %p274_p6 = pnand %p1539_p3, %p273_p5 }
   0xd   : > { %s1541_s15 = sshll.u32 (!%p274_p6), %s2009_s7, 5  ;;  %s307_s22 = sand.u32 (!%p274_p6), 1, %s1870_s29  }
   0xe   : > { %277 = sbr.rel (%p274_p6) target bundleno = 950 (0x3b6), region = 52  ;;  %p315_p7 = scmp.lt.s32.totalorder (!%p274_p6), %s1541_s15, 37 }
   0xf   : > { %s1540_s23 = sshll.u32 (!%p274_p6), %s307_s22, 1 }
  0x10   : > { %s2268_s24 = scalar_lea.vmem (!%p274_p6), [#allocation3], %s1540_s23  }
  0x13   : > { %v2029_v1 = vld [vmem:[%s2694_s1] sm:$0xff]   ;;  %vm454_vm0 = vcmask 261120   ;;  %s2718_s15 = smov (!%p315_p7, %s1541_s15), 37  ;;  %v1944_v2 = vmov 0   ;;  %v392_v3 = vld [vmem:[%s2695_s2 + $0x30] sm:$0xff]  ;;  %v393_v5 = vld [vmem:[%s2695_s2 + $0x38] sm:$0xff] }
  0x14   : > { %1610 = vmatprep.mubr.msk.bf16.mxu0 %vm454_vm0, %v2029_v1  ;;  %1782 = vset.pattern.permute.xlu0 %v1944_v2  ;;  %s1542_s20 = sshll.u32 %s2718_s15, 3  ;;  %v390_v4 = vld [vmem:[%s2695_s2 + $0x20] sm:$0xff]  ;;  %v391_v6 = vld [vmem:[%s2695_s2 + $0x28] sm:$0xff]  ;;  %v388_v18 = vld [vmem:[%s2695_s2 + $0x10] sm:$0xff] }
  0x15   : > { %1783 = vset.pattern.permute.xlu1 %v1944_v2  ;;  %765 = vmatprep.mubr.bf16.mxu1 %v1944_v2  ;;  %s2045_s25 = scalar_lea.vmem %s2693_s0, %s1542_s20  ;;  %v389_v20 = vld [vmem:[%s2695_s2 + $0x18] sm:$0xff]  ;;  %v386_v24 = vld [vmem:[%s2695_s2] sm:$0xff]  ;;  %v387_v25 = vld [vmem:[%s2695_s2 + $0x8] sm:$0xff] }
  0x16   : > { %426 = vperm.xlu0 %1782, %v392_v3   ;;  %416 = vperm.xlu1 %1783, %v390_v4   ;;  %v360_v7 = vld [vmem:[%s2045_s25 + $0xf0] sm:$0xff]  ;;  %v361_v8 = vld [vmem:[%s2045_s25 + $0xf8] sm:$0xff]  ;;  %v358_v12 = vld [vmem:[%s2045_s25 + $0xe0] sm:$0xff] }
  0x17   : > { %v344_v9 = vld [vmem:[%s2045_s25 + $0x70] sm:$0xff]  ;;  %v377_v10 = vpack.c.bf16 %v361_v8, %v360_v7  ;;  %v345_v11 = vld [vmem:[%s2045_s25 + $0x78] sm:$0xff]  ;;  %v359_v13 = vld [vmem:[%s2045_s25 + $0xe8] sm:$0xff] }
  0x18   : > { %v369_v14 = vpack.c.bf16 %v345_v11, %v344_v9  ;;  %v376_v15 = vpack.c.bf16 %v359_v13, %v358_v12  ;;  %v342_v16 = vld [vmem:[%s2045_s25 + $0x60] sm:$0xff]  ;;  %v343_v17 = vld [vmem:[%s2045_s25 + $0x68] sm:$0xff]  ;;  %v356_v22 = vld [vmem:[%s2045_s25 + $0xd0] sm:$0xff] }
  0x19   : > { %1618 = vmatprep.subr.msk.bf16.mxu0 %vm454_vm0, %v377_v10  ;;  %v368_v21 = vpack.c.bf16 %v343_v17, %v342_v16  ;;  %v357_v23 = vld [vmem:[%s2045_s25 + $0xd8] sm:$0xff]  ;;  %v340_v28 = vld [vmem:[%s2045_s25 + $0x50] sm:$0xff]  ;;  %v354_v32 = vld [vmem:[%s2045_s25 + $0xc0] sm:$0xff] }
  0x1a   : > { %431 = vperm.xlu0 %1782, %v393_v5   ;;  %421 = vperm.xlu1 %1783, %v391_v6   ;;  %v489_v19 = vsel %vm454_vm0, %v369_v14, 0  ;;  %v375_v27 = vpack.c.bf16 %v357_v23, %v356_v22  ;;  %v341_v29 = vld [vmem:[%s2045_s25 + $0x58] sm:$0xff]  ;;  %v658_v30 = vld [vmem:[%s2697_s4 + $0x30] sm:$0xff]  ;;  %v355_v33 = vld [vmem:[%s2045_s25 + $0xc8] sm:$0xff] }
  0x1b   : > { %1595 = vmatpush3.bf16.xpose.msra.mxu0 %v489_v19  ;;  %v486_v26 = vsel %vm454_vm0, %v368_v21, 0  ;;  %v659_v31 = vld [vmem:[%s2697_s4 + $0x38] sm:$0xff]  ;;  %v656_v34 = vld [vmem:[%s2697_s4 + $0x20] sm:$0xff]  ;;  %v367_v35 = vpack.c.bf16 %v341_v29, %v340_v28  ;;  %v657_v36 = vld [vmem:[%s2697_s4 + $0x28] sm:$0xff]  ;;  %v374_v38 = vpack.c.bf16 %v355_v33, %v354_v32 }
  0x1c   : > { %1619 = vmatprep.subr.msk.bf16.mxu0 %vm454_vm0, %v376_v15  ;;  %v338_v39 = vld [vmem:[%s2045_s25 + $0x40] sm:$0xff]  ;;  %v339_v40 = vld [vmem:[%s2045_s25 + $0x48] sm:$0xff]  ;;  %v654_v41 = vld [vmem:[%s2697_s4 + $0x10] sm:$0xff] }
  0x1d   : > { %v483_v37 = vsel %vm454_vm0, %v367_v35, 0  ;;  %v655_v42 = vld [vmem:[%s2697_s4 + $0x18] sm:$0xff]  ;;  %v366_v43 = vpack.c.bf16 %v339_v40, %v338_v39  ;;  %v352_v44 = vld [vmem:[%s2045_s25 + $0xb0] sm:$0xff]  ;;  %v652_v46 = vld [vmem:[%s2697_s4] sm:$0xff] }
  0x1e   : > { %406 = vperm.xlu0 %1782, %v388_v18   ;;  %411 = vperm.xlu1 %1783, %v389_v20   ;;  %v353_v45 = vld [vmem:[%s2045_s25 + $0xb8] sm:$0xff]  ;;  %v653_v47 = vld [vmem:[%s2697_s4 + $0x8] sm:$0xff]  ;;  %v336_v50 = vld [vmem:[%s2045_s25 + $0x30] sm:$0xff] }
  0x1f   : > { %v480_v48 = vsel %vm454_vm0, %v366_v43, 0  ;;  %v373_v49 = vpack.c.bf16 %v353_v45, %v352_v44  ;;  %v337_v51 = vld [vmem:[%s2045_s25 + $0x38] sm:$0xff]  ;;  %v952_v52 = vld [vmem:[#allocation2] sm:$0x1]  ;;  %v351_v55 = vld [vmem:[%s2045_s25 + $0xa8] sm:$0xff] }
  0x20   : > { %v365_v53 = vpack.c.bf16 %v337_v51, %v336_v50  ;;  %v350_v54 = vld [vmem:[%s2045_s25 + $0xa0] sm:$0xff]  ;;  %v335_v59 = vld [vmem:[%s2045_s25 + $0x28] sm:$0xff]  ;;  %v348_v61 = vld [vmem:[%s2045_s25 + $0x90] sm:$0xff] }
  0x21   : > { %v372_v57 = vpack.c.bf16 %v351_v55, %v350_v54  ;;  %v334_v58 = vld [vmem:[%s2045_s25 + $0x20] sm:$0xff]  ;;  %v349_v62 = vld [vmem:[%s2045_s25 + $0x98] sm:$0xff]  ;;  %v332_v3 = vld [vmem:[%s2045_s25 + $0x10] sm:$0xff] }
  0x22   : > { %396 = vperm.xlu0 %1782, %v386_v24   ;;  %401 = vperm.xlu1 %1783, %v387_v25   ;;  %v477_v56 = vsel %vm454_vm0, %v365_v53, 0  ;;  %v364_v60 = vpack.c.bf16 %v335_v59, %v334_v58  ;;  %v371_v0 = vpack.c.bf16 %v349_v62, %v348_v61  ;;  %v333_v4 = vld [vmem:[%s2045_s25 + $0x18] sm:$0xff]  ;;  %v346_v6 = vld [vmem:[%s2045_s25 + $0x80] sm:$0xff]  ;;  %v347_v7 = vld [vmem:[%s2045_s25 + $0x88] sm:$0xff] }
  0x23   : > { %1597 = vmatpush3.bf16.xpose.msra.mxu0 %v486_v26  ;;  %v363_v5 = vpack.c.bf16 %v333_v4, %v332_v3  ;;  %v370_v9 = vpack.c.bf16 %v347_v7, %v346_v6  ;;  %v330_v10 = vld [vmem:[%s2045_s25] sm:$0xff]  ;;  %v331_v11 = vld [vmem:[%s2045_s25 + $0x8] sm:$0xff]  ;;  %v1786_v15 = vld [vmem:[%s2694_s1 + $0x10] sm:$0xff]   ;;  %s1562_s25 = sshll.u32 (%p2021_p4), %s2009_s7, 1 }
  0x24   : > { %1620 = vmatprep.subr.msk.bf16.mxu0 %vm454_vm0, %v375_v27  ;;  %v474_v63 = vsel %vm454_vm0, %v364_v60, 0  ;;  %v362_v12 = vpack.c.bf16 %v331_v11, %v330_v10  ;;  %v1785_v14 = vld [vmem:[%s2694_s1 + $0x8] sm:$0xff]   ;;  %v1787_v16 = vld [vmem:[%s2694_s1 + $0x18] sm:$0xff]   ;;  %s995_s29 = ssub.s32 (%p2021_p4), 3, %s1562_s25  ;;  %s2277_s28 = scalar_lea.vmem (%p2021_p4), %s2701_s8, %s1562_s25  }
  0x25   : > { %v471_v8 = vsel %vm454_vm0, %v363_v5, 0  ;;  %p996_p8 = scmp.lt.s32.totalorder (%p2021_p4), %s995_s29, 2 }
  0x26   : > { %692 = vperm.xlu0 %1782, %v658_v30   ;;  %697 = vperm.xlu1 %1783, %v659_v31   ;;  %v468_v13 = vsel %vm454_vm0, %v362_v12, 0 }
  0x2a   : > { %682 = vperm.xlu0 %1782, %v656_v34   ;;  %687 = vperm.xlu1 %1783, %v657_v36  }
  0x2b   : > { %1599 = vmatpush3.bf16.xpose.msra.mxu0 %v483_v37 }
  0x2c   : > { %1621 = vmatprep.subr.msk.bf16.mxu0 %vm454_vm0, %v374_v38 }
  0x2e   : > { %672 = vperm.xlu0 %1782, %v654_v41   ;;  %677 = vperm.xlu1 %1783, %v655_v42  }
  0x32   : > { %662 = vperm.xlu0 %1782, %v652_v46   ;;  %667 = vperm.xlu1 %1783, %v653_v47  }
  0x33   : > { %1601 = vmatpush3.bf16.xpose.msra.mxu0 %v480_v48 }
  0x34   : > { %1622 = vmatprep.subr.msk.bf16.mxu0 %vm454_vm0, %v373_v49 }
  0x36   : > { %955 = vperm.xlu0 %1782, %v952_v52  }
  0x3b   : > { %1603 = vmatpush3.bf16.xpose.msra.mxu0 %v477_v56 }
  0x3c   : > { %1623 = vmatprep.subr.msk.bf16.mxu0 %vm454_vm0, %v372_v57 }
  0x43   : > { %1605 = vmatpush3.bf16.xpose.msra.mxu0 %v474_v63 }
  0x44   : > { %1624 = vmatprep.subr.msk.bf16.mxu0 %vm454_vm0, %v371_v0 }
  0x4b   : > { %1607 = vmatpush3.bf16.xpose.msra.mxu0 %v471_v8 }
  0x4c   : > { %1625 = vmatprep.subr.msk.bf16.mxu0 %vm454_vm0, %v370_v9 }
  0x53   : > { %1609 = vmatpush3.bf16.xpose.msra.mxu0 %v468_v13 }
  0x5a   : > { %1611 = vmatmul.mubr.msk.bf16.vlgmr.msra.gmra.mxu0 %vm454_vm0, %v2029_v1 }
  0x5b   : > { %1612 = vmatprep.mubr.msk.bf16.mxu0 %vm454_vm0, %v1785_v14 }
  0x62   : > { %1613 = vmatmul.mubr.msk.bf16.gmra.mxu0 %vm454_vm0, %v1785_v14 }
  0x63   : > { %1614 = vmatprep.mubr.msk.bf16.mxu0 %vm454_vm0, %v1786_v15 }
  0x6a   : > { %1615 = vmatmul.mubr.msk.bf16.gmra.mxu0 %vm454_vm0, %v1786_v15 }
  0x6b   : > { %1616 = vmatprep.mubr.msk.bf16.mxu0 %vm454_vm0, %v1787_v16 }
  0x72   : > { %1617 = vmatmul.mubr.msk.bf16.gmra.mxu0 %vm454_vm0, %v1787_v16 }
  0x91   : > { %v417_v20 = vpop.permute.xlu1 %416  ;;  %v427_v22 = vpop.permute.xlu0 %426 }
  0x95   : > { %v422_v25 = vpop.permute.xlu1 %421  ;;  %v432_v27 = vpop.permute.xlu0 %431 }
  0x99   : > { %v412_v30 = vpop.permute.xlu1 %411  ;;  %v407_v32 = vpop.permute.xlu0 %406 }
  0x9d   : > { %v402_v35 = vpop.permute.xlu1 %401  ;;  %v397_v38 = vpop.permute.xlu0 %396 }
 0x11a   : > { %v2154_v1 = vpop.f32.mrf.mxu0 }
 0x11b   : > { %v550_v16 = vadd.f32 %v2154_v1, %v397_v38 }
 0x11c   : > { %v551_v17 = vpop.f32.mrf.mxu0 }
 0x11d   : > { %v2156_v40 = vadd.f32 %v551_v17, %v397_v38  ;;  %vm588_vm0 = vcmp.gt.f32.partialorder %v550_v16, 0.0 }
 0x11e   : > { %v553_v18 = vpop.f32.mrf.mxu0 }
 0x11f   : > { %v2158_v41 = vadd.f32 %v553_v18, %v402_v35  ;;  %vm589_vm14 = vcmp.gt.f32.partialorder %v2156_v40, 0.0 }
 0x120   : > { %v555_v19 = vpop.f32.mrf.mxu0 }
 0x121   : > { %v2160_v42 = vadd.f32 %v555_v19, %v402_v35  ;;  %v605_v19 = vmul.f32 0.01, %v2156_v40  ;;  %v606_v1 = vmul.f32 0.01, %v2158_v41  ;;  %vm590_vm15 = vcmp.gt.f32.partialorder %v2158_v41, 0.0  ;;  %v1790_v35 = vld [vmem:[%s2696_s3 + $0x10] sm:$0xff]  }
 0x122   : > { %v559_v21 = vpop.f32.mrf.mxu0 }
 0x123   : > { %v2162_v45 = vadd.f32 %v559_v21, %v407_v32  ;;  %v607_v14 = vmul.f32 0.01, %v2160_v42  ;;  %vm591_vm12 = vcmp.gt.f32.partialorder %v2160_v42, 0.0 }
 0x124   : > { %v561_v23 = vpop.f32.mrf.mxu0 }
 0x125   : > { %v562_v46 = vadd.f32 %v561_v23, %v407_v32  ;;  %v608_v17 = vmul.f32 0.01, %v2162_v45  ;;  %vm592_vm13 = vcmp.gt.f32.partialorder %v2162_v45, 0.0 }
 0x126   : > { %v563_v24 = vpop.f32.mrf.mxu0 }
 0x127   : > { %v564_v49 = vadd.f32 %v563_v24, %v412_v30  ;;  %v609_v8 = vmul.f32 0.01, %v562_v46  ;;  %vm593_vm10 = vcmp.gt.f32.partialorder %v562_v46, 0.0  ;;  %v623_v24 = vsel %vm591_vm12, %v2160_v42, %v607_v14  ;;  %v693_v42 = vpop.permute.xlu0 %692 }
 0x128   : > { %v565_v26 = vpop.f32.mrf.mxu0 }
 0x129   : > { %v566_v50 = vadd.f32 %v565_v26, %v412_v30  ;;  %v610_v11 = vmul.f32 0.01, %v564_v49  ;;  %vm594_vm11 = vcmp.gt.f32.partialorder %v564_v49, 0.0  ;;  %v625_v21 = vsel %vm593_vm10, %v562_v46, %v609_v8 }
 0x12a   : > { %v569_v28 = vpop.f32.mrf.mxu0  ;;  %v624_v26 = vsel %vm592_vm13, %v2162_v45, %v608_v17  ;;  %v622_v30 = vsel %vm590_vm15, %v2158_v41, %v606_v1 }
 0x12b   : > { %v570_v57 = vadd.f32 %v569_v28, %v417_v20  ;;  %v611_v61 = vmul.f32 0.01, %v566_v50  ;;  %vm595_vm8 = vcmp.gt.f32.partialorder %v566_v50, 0.0  ;;  %v626_v23 = vsel %vm594_vm11, %v564_v49, %v610_v11 }
 0x12c   : > { %v571_v29 = vpop.f32.mrf.mxu0  ;;  %v621_v28 = vsel %vm589_vm14, %v2156_v40, %v605_v19 }
 0x12d   : > { %v572_v47 = vadd.f32 %v571_v29, %v417_v20  ;;  %v612_v5 = vmul.f32 0.01, %v570_v57  ;;  %vm596_vm9 = vcmp.gt.f32.partialorder %v570_v57, 0.0  ;;  %v627_v15 = vsel %vm595_vm8, %v566_v50, %v611_v61 }
 0x12e   : > { %v573_v31 = vpop.f32.mrf.mxu0  ;;  %v2197_v29 = vpack.c.bf16 %v623_v24, %v621_v28 }
 0x12f   : > { %v574_v51 = vadd.f32 %v573_v31, %v422_v25  ;;  %v613_v59 = vmul.f32 0.01, %v572_v47  ;;  %vm597_vm6 = vcmp.gt.f32.partialorder %v572_v47, 0.0  ;;  %v628_v18 = vsel %vm596_vm9, %v570_v57, %v612_v5 }
 0x130   : > { %v575_v33 = vpop.f32.mrf.mxu0 }
 0x131   : > { %v576_v36 = vadd.f32 %v575_v33, %v422_v25  ;;  %v614_v62 = vmul.f32 0.01, %v574_v51  ;;  %vm598_vm7 = vcmp.gt.f32.partialorder %v574_v51, 0.0  ;;  %v629_v10 = vsel %vm597_vm6, %v572_v47, %v613_v59  ;;  %v1788_v33 = vld [vmem:[%s2696_s3] sm:$0xff]   ;;  %v683_v47 = vpop.permute.xlu0 %682 }
 0x132   : > { %v579_v34 = vpop.f32.mrf.mxu0  ;;  %v604_v25 = vmul.f32 0.01, %v550_v16 }
 0x133   : > { %v580_v43 = vadd.f32 %v579_v34, %v427_v22  ;;  %v615_v52 = vmul.f32 0.01, %v576_v36  ;;  %vm599_vm2 = vcmp.gt.f32.partialorder %v576_v36, 0.0  ;;  %v630_v13 = vsel %vm598_vm7, %v574_v51, %v614_v62  ;;  %v1789_v34 = vld [vmem:[%s2696_s3 + $0x8] sm:$0xff]  }
 0x134   : > { %v581_v37 = vpop.f32.mrf.mxu0  ;;  %v2182_v20 = vpack.c.bf16 %v630_v13, %v628_v18  ;;  %v620_v31 = vsel %vm588_vm0, %v550_v16, %v604_v25 }
 0x135   : > { %v582_v39 = vadd.f32 %v581_v37, %v427_v22  ;;  %v616_v58 = vmul.f32 0.01, %v580_v43  ;;  %vm600_vm5 = vcmp.gt.f32.partialorder %v580_v43, 0.0  ;;  %v631_v4 = vsel %vm599_vm2, %v576_v36, %v615_v52  ;;  %v1791_v36 = vld [vmem:[%s2696_s3 + $0x18] sm:$0xff]   ;;  %v673_v52 = vpop.permute.xlu0 %672 }
 0x136   : > { %v583_v44 = vpop.f32.mrf.mxu0  ;;  %v2169_v12 = vpack.c.bf16 %v631_v4, %v629_v10  ;;  %v2187_v22 = vpack.c.bf16 %v627_v15, %v625_v21  ;;  %v2202_v32 = vpack.c.bf16 %v622_v30, %v620_v31 }
 0x137   : > { %v584_v48 = vadd.f32 %v583_v44, %v432_v27  ;;  %v617_v54 = vmul.f32 0.01, %v582_v39  ;;  %vm601_vm3 = vcmp.gt.f32.partialorder %v582_v39, 0.0  ;;  %v632_v7 = vsel %vm600_vm5, %v580_v43, %v616_v58  ;;  %v698_v43 = vpop.permute.xlu1 %697 }
 0x138   : > { %v585_v53 = vpop.f32.mrf.mxu0 }
 0x139   : > { %v618_v55 = vmul.f32 0.01, %v584_v48  ;;  %v586_v56 = vadd.f32 %v585_v53, %v432_v27  ;;  %vm602_vm1 = vcmp.gt.f32.partialorder %v584_v48, 0.0  ;;  %v633_v0 = vsel %vm601_vm3, %v582_v39, %v617_v54  ;;  %v663_v58 = vpop.permute.xlu0 %662 }
 0x13a   : > { %v2194_v27 = vpack.c.bf16 %v626_v23, %v624_v26 }
 0x13b   : > { %v619_v60 = vmul.f32 0.01, %v586_v56  ;;  %vm603_vm4 = vcmp.gt.f32.partialorder %v586_v56, 0.0  ;;  %v634_v63 = vsel %vm602_vm1, %v584_v48, %v618_v55  ;;  %vm720_vm1 = vcmask 523264   ;;  %v688_v48 = vpop.permute.xlu1 %687 }
 0x13c   : > { %v2166_v9 = vpack.c.bf16 %v634_v63, %v632_v7 }
 0x13d   : > { %v635_v3 = vsel %vm603_vm4, %v586_v56, %v619_v60 }
 0x13e   : > { %v2164_v6 = vpack.c.bf16 %v635_v3, %v633_v0 }
 0x13f   : > { %v678_v53 = vpop.permute.xlu1 %677 }
 0x140   : > { %741 = vmatprep.subr.bf16.mxu1 %v2164_v6 }
 0x141   : > { %742 = vmatpush1.bf16.msra.mxu1 %v2166_v9 }
 0x142   : > { %743 = vmatprep.subr.bf16.mxu1 %v2169_v12 }
 0x143   : > { %v668_v59 = vpop.permute.xlu1 %667 }
 0x145   : > { %744 = vmatpush1.bf16.msra.mxu1 %v2182_v20 }
 0x146   : > { %745 = vmatprep.subr.bf16.mxu1 %v2187_v22 }
 0x149   : > { %746 = vmatpush1.bf16.msra.mxu1 %v2194_v27 }
 0x14a   : > { %747 = vmatprep.subr.bf16.mxu1 %v2197_v29 }
 0x14d   : > { %748 = vmatpush1.bf16.msra.mxu1 %v2202_v32 }
 0x150   : > { %1555 = vmatmul.mubr.msk.bf16.vlgmr.msra.gmra.mxu1 %vm720_vm1, %v1788_v33 }
 0x151   : > { %775 = vmatprep.mubr.bf16.mxu1 %v1944_v2 }
 0x158   : > { %1556 = vmatmul.mubr.msk.bf16.gmra.mxu1 %vm720_vm1, %v1789_v34 }
 0x159   : > { %785 = vmatprep.mubr.bf16.mxu1 %v1944_v2 }
 0x160   : > { %1557 = vmatmul.mubr.msk.bf16.gmra.mxu1 %vm720_vm1, %v1790_v35 }
 0x161   : > { %795 = vmatprep.mubr.bf16.mxu1 %v1944_v2 }
 0x168   : > { %1558 = vmatmul.mubr.msk.bf16.gmra.mxu1 %vm720_vm1, %v1791_v36 }
 0x169   : > { %899 = vmatprep.mubr.bf16.mxu1 %v1944_v2 }
 0x210   : > { %v2225_v37 = vpop.f32.mrf.mxu1 }
 0x212   : > { %v769_v38 = vpop.f32.mrf.mxu1 }
 0x213   : > { %v2227_v61 = vadd.f32 %v769_v38, %v663_v58 }
 0x214   : > { %v771_v39 = vpop.f32.mrf.mxu1 }
 0x215   : > { %v2229_v62 = vadd.f32 %v771_v39, %v668_v59  ;;  %vm807_vm15 = vcmp.gt.f32.partialorder %v2227_v61, 0.0 }
 0x216   : > { %v773_v40 = vpop.f32.mrf.mxu1 }
 0x217   : > { %v2231_v63 = vadd.f32 %v773_v40, %v668_v59  ;;  %vm808_vm0 = vcmp.gt.f32.partialorder %v2229_v62, 0.0 }
 0x218   : > { %v777_v41 = vpop.f32.mrf.mxu1 }
 0x219   : > { %v2233_v4 = vadd.f32 %v777_v41, %v673_v52  ;;  %vm809_vm13 = vcmp.gt.f32.partialorder %v2231_v63, 0.0 }
 0x21a   : > { %v779_v44 = vpop.f32.mrf.mxu1 }
 0x21b   : > { %v780_v5 = vadd.f32 %v779_v44, %v673_v52  ;;  %vm810_vm14 = vcmp.gt.f32.partialorder %v2233_v4, 0.0 }
 0x21c   : > { %v781_v45 = vpop.f32.mrf.mxu1 }
 0x21d   : > { %v782_v10 = vadd.f32 %v781_v45, %v678_v53  ;;  %v827_v36 = vmul.f32 0.01, %v780_v5  ;;  %vm811_vm11 = vcmp.gt.f32.partialorder %v780_v5, 0.0  ;;  %v768_v45 = vadd.f32 %v2225_v37, %v663_v58 }
 0x21e   : > { %v783_v46 = vpop.f32.mrf.mxu1 }
 0x21f   : > { %v784_v11 = vadd.f32 %v783_v46, %v678_v53  ;;  %v828_v40 = vmul.f32 0.01, %v782_v10  ;;  %vm812_vm12 = vcmp.gt.f32.partialorder %v782_v10, 0.0  ;;  %v826_v46 = vmul.f32 0.01, %v2233_v4 }
 0x220   : > { %v787_v49 = vpop.f32.mrf.mxu1 }
 0x221   : > { %v788_v19 = vadd.f32 %v787_v49, %v683_v47  ;;  %v829_v24 = vmul.f32 0.01, %v784_v11  ;;  %vm813_vm9 = vcmp.gt.f32.partialorder %v784_v11, 0.0  ;;  %v844_v52 = vsel %vm812_vm12, %v782_v10, %v828_v40 }
 0x222   : > { %v789_v50 = vpop.f32.mrf.mxu1 }
 0x223   : > { %v790_v7 = vadd.f32 %v789_v50, %v683_v47  ;;  %v830_v33 = vmul.f32 0.01, %v788_v19  ;;  %vm814_vm10 = vcmp.gt.f32.partialorder %v788_v19, 0.0  ;;  %v845_v44 = vsel %vm813_vm9, %v784_v11, %v829_v24 }
 0x224   : > { %v791_v51 = vpop.f32.mrf.mxu1  ;;  %v843_v50 = vsel %vm811_vm11, %v780_v5, %v827_v36 }
 0x225   : > { %v792_v13 = vadd.f32 %v791_v51, %v688_v48  ;;  %v831_v1 = vmul.f32 0.01, %v790_v7  ;;  %vm815_vm7 = vcmp.gt.f32.partialorder %v790_v7, 0.0  ;;  %v846_v47 = vsel %vm814_vm10, %v788_v19, %v830_v33 }
 0x226   : > { %v793_v54 = vpop.f32.mrf.mxu1  ;;  %v824_v51 = vmul.f32 0.01, %v2229_v62  ;;  %v857_v53 = vpack.c.bf16 %v845_v44, %v843_v50 }
 0x227   : > { %v794_v56 = vadd.f32 %v793_v54, %v688_v48  ;;  %v832_v25 = vmul.f32 0.01, %v792_v13  ;;  %vm816_vm8 = vcmp.gt.f32.partialorder %v792_v13, 0.0  ;;  %v847_v39 = vsel %vm815_vm7, %v790_v7, %v831_v1 }
 0x228   : > { %v797_v55 = vpop.f32.mrf.mxu1  ;;  %v823_v48 = vmul.f32 0.01, %v2227_v61  ;;  %v822_v54 = vmul.f32 0.01, %v768_v45  ;;  %v840_v58 = vsel %vm808_vm0, %v2229_v62, %v824_v51 }
 0x229   : > { %v798_v0 = vadd.f32 %v797_v55, %v693_v42  ;;  %v833_v14 = vmul.f32 0.01, %v794_v56  ;;  %vm817_vm3 = vcmp.gt.f32.partialorder %v794_v56, 0.0  ;;  %v848_v41 = vsel %vm816_vm8, %v792_v13, %v832_v25 }
 0x22a   : > { %v799_v57 = vpop.f32.mrf.mxu1  ;;  %v858_v49 = vpack.c.bf16 %v848_v41, %v846_v47  ;;  %v842_v55 = vsel %vm810_vm14, %v2233_v4, %v826_v46  ;;  %v956_v4 = vpop.permute.xlu0 %955 }
 0x22b   : > { %v800_v60 = vadd.f32 %v799_v57, %v693_v42  ;;  %v834_v21 = vmul.f32 0.01, %v798_v0  ;;  %vm818_vm5 = vcmp.gt.f32.partialorder %v798_v0, 0.0  ;;  %v849_v31 = vsel %vm817_vm3, %v794_v56, %v833_v14 }
 0x22c   : > { %v801_v3 = vpop.f32.mrf.mxu1  ;;  %v859_v42 = vpack.c.bf16 %v849_v31, %v847_v39  ;;  %v856_v56 = vpack.c.bf16 %v844_v52, %v842_v55  ;;  %v839_v57 = vsel %vm807_vm15, %v2227_v61, %v823_v48 }
 0x22d   : > { %v802_v8 = vadd.f32 %v801_v3, %v698_v43  ;;  %v835_v16 = vmul.f32 0.01, %v800_v60  ;;  %vm819_vm4 = vcmp.gt.f32.partialorder %v800_v60, 0.0  ;;  %v850_v34 = vsel %vm818_vm5, %v798_v0, %v834_v21 }
 0x22e   : > { %v803_v15 = vpop.f32.mrf.mxu1 }
 0x22f   : > { %vm820_vm2 = vcmp.gt.f32.partialorder %v802_v8, 0.0  ;;  %v836_v17 = vmul.f32 0.01, %v802_v8  ;;  %v804_v18 = vadd.f32 %v803_v15, %v698_v43  ;;  %v851_v28 = vsel %vm819_vm4, %v800_v60, %v835_v16 }
 0x230   : > { %v825_v43 = vmul.f32 0.01, %v2231_v63 }
 0x231   : > { %vm821_vm6 = vcmp.gt.f32.partialorder %v804_v18, 0.0  ;;  %v837_v23 = vmul.f32 0.01, %v804_v18  ;;  %v852_v26 = vsel %vm820_vm2, %v802_v8, %v836_v17  ;;  %vm806_vm2 = vcmp.gt.f32.partialorder %v768_v45, 0.0 }
 0x232   : > { %v860_v38 = vpack.c.bf16 %v852_v26, %v850_v34  ;;  %v841_v37 = vsel %vm809_vm13, %v2231_v63, %v825_v43  ;;  %v838_v60 = vsel %vm806_vm2, %v768_v45, %v822_v54  ;;  %v863_v63 = vld [vmem:[%s2699_s6] sm:$0x1] }
 0x233   : > { %v853_v30 = vsel %vm821_vm6, %v804_v18, %v837_v23  ;;  %v855_v59 = vpack.c.bf16 %v841_v37, %v839_v57  ;;  %v854_v0 = vpack.c.bf16 %v840_v58, %v838_v60 }
 0x234   : > { %v861_v35 = vpack.c.bf16 %v853_v30, %v851_v28 }
 0x236   : > { %875 = vmatprep.subr.bf16.mxu1 %v861_v35 }
 0x237   : > { %876 = vmatpush1.bf16.msra.mxu1 %v860_v38 }
 0x238   : > { %877 = vmatprep.subr.bf16.mxu1 %v859_v42 }
 0x23b   : > { %878 = vmatpush1.bf16.msra.mxu1 %v858_v49 }
 0x23c   : > { %879 = vmatprep.subr.bf16.mxu1 %v857_v53 }
 0x23f   : > { %880 = vmatpush1.bf16.msra.mxu1 %v856_v56 }
 0x240   : > { %881 = vmatprep.subr.bf16.mxu1 %v855_v59 }
 0x243   : > { %882 = vmatpush1.bf16.msra.mxu1 %v854_v0 }
 0x244   : > { %919 = vmatprep.subr.bf16.mxu1 %v2164_v6  ;;  %v862_v6 = vld [vmem:[%s2698_s5] sm:$0x1] }
 0x246   : > { %1559 = vmatmul.mubr.msk.bf16.vlgmr.msra.gmra.mxu1 %vm720_vm1, %v863_v63 }
 0x247   : > { %920 = vmatpush1.bf16.msra.mxu1 %v2166_v9  ;;  %943 = vmatprep.mubr.bf16.mxu1 %v1944_v2 }
 0x248   : > { %921 = vmatprep.subr.bf16.mxu1 %v2169_v12 }
 0x24b   : > { %922 = vmatpush1.bf16.msra.mxu1 %v2182_v20  ;;  %v958_v20 = vlaneseq }
 0x24c   : > { %923 = vmatprep.subr.bf16.mxu1 %v2187_v22  ;;  %v1945_v22 = vmov 1966171168  }
 0x24d   : > { %v959_v62 = vshrl.u32 %v958_v20, 7  ;;  %v968_v3 = vunpack.c.l.s4 %v1945_v22 }
 0x24f   : > { %924 = vmatpush1.bf16.msra.mxu1 %v2194_v27  ;;  %v960_v27 = vsub.s32 0, %v959_v62  ;;  %v969_v5 = vunpack.c.0.s8 %v968_v3 }
 0x250   : > { %925 = vmatprep.subr.bf16.mxu1 %v2197_v29 }
 0x251   : > { %v961_v8 = vrot.slane %v956_v4, %v960_v27  ;;  %v972_v13 = vsub.s32 %v969_v5, %v959_v62 }
 0x253   : > { %926 = vmatpush1.bf16.msra.mxu1 %v2202_v32 }
 0x256   : > { %1560 = vmatmul.mubr.msk.bf16.vlgmr.msra.gmra.mxu1 %vm720_vm1, %v862_v6  ;;  %vm984_vm1 = vcmp.lt.s32.totalorder %v958_v20, 256 }
 0x306   : > { %v901_v9 = vpop.f32.mrf.mxu1 }
 0x308   : > { %v903_v2 = vpop.f32.mrf.mxu1 }
 0x30a   : > { %v905_v12 = vpop.f32.mrf.mxu1 }
 0x30c   : > { %v906_v61 = vpop.f32.mrf.mxu1 }
 0x316   : > { %v945_v29 = vpop.f32.mrf.mxu1 }
 0x317   : > { %v946_v32 = vadd.f32 %v945_v29, %v901_v9 }
 0x318   : > { %v947_v7 = vpop.f32.mrf.mxu1 }
 0x319   : > { %v948_v10 = vadd.f32 %v947_v7, %v903_v2  ;;  %v962_v14 = vadd.f32 %v961_v8, %v946_v32 }
 0x31a   : > { %v949_v11 = vpop.f32.mrf.mxu1 }
 0x31b   : > { %v963_v15 = vadd.f32 %v961_v8, %v948_v10 }
 0x31c   : > { %v950_v16 = vpop.f32.mrf.mxu1 }
 0x31d   : > { %v966_v17 = vcombine.low %v962_v14, %v963_v15 }
 0x31f   : > { %v973_v18 = vrot.slane %v966_v17, %v972_v13  ;;  %993 = sbr.rel (!%p2021_p4) target bundleno = 950 (0x3b6), region = 56 }
 0x321   : > { %v980_v19 = vrot.slane %v973_v18, %v972_v13 }
 0x323   : > { %986 = vst.msk [vmem:[%s2268_s24] sm:$0x3] %vm984_vm1, %v980_v19 }
 0x324   : > { %s2720_s29 = smov (!%p996_p8, %s995_s29), 2 }
 0x325   : > { %s1563_s9 = sshll.u32 %s2720_s29, 4 }
 0x326   : > { %p1565_p9 = scmp.eq.s32.totalorder %s1563_s9, 0 }
 0x327   : > { %p1004_p10 = scmp.lt.u32.totalorder (!%p1565_p9), %s2720_s29, 8 }
 0x328   : > { %1003 = sbr.rel (%p1565_p9) target bundleno = 950 (0x3b6), region = 60 }
 0x32d   : > { %1007 = sbr.rel (%p1004_p10) target bundleno = 941 (0x3ad), region = 64  ;;  %s2284_s14 = sand.u32 (!%p1004_p10), 7, %s2720_s29  }
 0x32e   : > { %p1024_p11 = scmp.eq.s32.totalorder (!%p1004_p10), %s2284_s14, 0  ;;  %p1566_p12 = scmp.ne.s32.totalorder (!%p1004_p10), %s2284_s14, 0 }
 0x332   : > { %1027 = sbr.rel (%p1566_p12) target bundleno = 877 (0x36d), region = 79  ;;  %s1028_s7 = sshrl.u32 (!%p1566_p12), %s2720_s29, 3 }
 0x333   : > { %s2291_s11 = sshrl.u32 (!%p1566_p12), %s1028_s7, 6 }
 0x334   : > { %p1567_p13 = scmp.le.s32.totalorder (!%p1566_p12), %s2291_s11, 0 }
 0x337   : > { %1464 = sbr.rel (%p1567_p13) target bundleno = 861 (0x35d), region = 160  ;;  %s2703_s12 = smov (!%p1567_p13), %s2277_s28 }
 0x338   : > { %s2704_s15 = smov (!%p1567_p13), %s2268_s24  ;;  %s2300_s16 = smov (!%p1567_p13), 0  }
 0x339   : > { %s2302_s17 = smov (!%p1567_p13), 0  }
 0x33c LB: >> { %v1041_v21 = vld [vmem:[%s1886_s15] sm:$0xff]  ;;  %v1043_v1 = vld [vmem:[%s1886_s15 + $0x8] sm:$0xff]  ;;  %v1045_v23 = vld [vmem:[%s1886_s15 + $0x10] sm:$0xff]  ;;  %s1169_s18 = sadd.s32 1, %s1890_s16  ;;  %s1035_s17 = sadd.s32 1, %s1894_s17   ;;  %s1894_s17 = sphi %s2302_s17, %s1035_s17   ;;  %s1890_s16 = sphi %s2300_s16, %s2707_s16   ;;  %s1886_s15 = sphi %s2704_s15, %s2706_s15   ;;  %s1882_s12 = sphi %s2703_s12, %s2705_s12  }
 0x33d   : >> { %1042 = vst [vmem:[%s1882_s12] sm:$0xff] %v1041_v21  ;;  %1044 = vst [vmem:[%s1882_s12 + $0x8] sm:$0xff] %v1043_v1  ;;  %v1047_v24 = vld [vmem:[%s1886_s15 + $0x18] sm:$0xff]  ;;  %v1049_v25 = vld [vmem:[%s1886_s15 + $0x20] sm:$0xff]  ;;  %p1170_p0 = scmp.ge.s32.totalorder %s1169_s18, %s2291_s11  ;;  %p1034_p1 = scmp.ge.s32.totalorder %s1035_s17, %s2291_s11 }
 0x33e   : >> { %1046 = vst [vmem:[%s1882_s12 + $0x10] sm:$0xff] %v1045_v23  ;;  %v1051_v26 = vld [vmem:[%s1886_s15 + $0x28] sm:$0xff]  ;;  %1048 = vst [vmem:[%s1882_s12 + $0x18] sm:$0xff] %v1047_v24  ;;  %v1053_v28 = vld [vmem:[%s1886_s15 + $0x30] sm:$0xff] }
 0x33f   : >> { %1050 = vst [vmem:[%s1882_s12 + $0x20] sm:$0xff] %v1049_v25  ;;  %1052 = vst [vmem:[%s1882_s12 + $0x28] sm:$0xff] %v1051_v26  ;;  %v1055_v30 = vld [vmem:[%s1886_s15 + $0x38] sm:$0xff]  ;;  %v1057_v31 = vld [vmem:[%s1886_s15 + $0x40] sm:$0xff]  ;;  %s2722_s18 = smov (%p1170_p0, %s1169_s18), 0 }
 0x340   : >> { %1054 = vst [vmem:[%s1882_s12 + $0x30] sm:$0xff] %v1053_v28  ;;  %1056 = vst [vmem:[%s1882_s12 + $0x38] sm:$0xff] %v1055_v30  ;;  %v1059_v33 = vld [vmem:[%s1886_s15 + $0x48] sm:$0xff]  ;;  %v1061_v34 = vld [vmem:[%s1886_s15 + $0x50] sm:$0xff]  ;;  %s1568_s19 = sshll.u32 %s2722_s18, 9  ;;  %s2707_s16 = smov %s2722_s18 }
 0x341   : >> { %1058 = vst [vmem:[%s1882_s12 + $0x40] sm:$0xff] %v1057_v31  ;;  %v1063_v35 = vld [vmem:[%s1886_s15 + $0x58] sm:$0xff]  ;;  %1060 = vst [vmem:[%s1882_s12 + $0x48] sm:$0xff] %v1059_v33  ;;  %v1065_v36 = vld [vmem:[%s1886_s15 + $0x60] sm:$0xff]  ;;  %s2358_s20 = scalar_lea.vmem %s2268_s24, %s1568_s19 [#allocation3]   ;;  %s2361_s21 = scalar_lea.vmem %s2277_s28, %s1568_s19  }
 0x342   : >> { %1062 = vst [vmem:[%s1882_s12 + $0x50] sm:$0xff] %v1061_v34  ;;  %1064 = vst [vmem:[%s1882_s12 + $0x58] sm:$0xff] %v1063_v35  ;;  %v1067_v38 = vld [vmem:[%s1886_s15 + $0x68] sm:$0xff]  ;;  %v1069_v39 = vld [vmem:[%s1886_s15 + $0x70] sm:$0xff] }
 0x343   : >> { %1066 = vst [vmem:[%s1882_s12 + $0x60] sm:$0xff] %v1065_v36  ;;  %1068 = vst [vmem:[%s1882_s12 + $0x68] sm:$0xff] %v1067_v38  ;;  %v1071_v40 = vld [vmem:[%s1886_s15 + $0x78] sm:$0xff]  ;;  %v1073_v41 = vld [vmem:[%s1886_s15 + $0x80] sm:$0xff] }
 0x344   : >> { %1070 = vst [vmem:[%s1882_s12 + $0x70] sm:$0xff] %v1069_v39  ;;  %v1075_v42 = vld [vmem:[%s1886_s15 + $0x88] sm:$0xff]  ;;  %1072 = vst [vmem:[%s1882_s12 + $0x78] sm:$0xff] %v1071_v40  ;;  %v1077_v43 = vld [vmem:[%s1886_s15 + $0x90] sm:$0xff] }
 0x345   : >> { %1074 = vst [vmem:[%s1882_s12 + $0x80] sm:$0xff] %v1073_v41  ;;  %1076 = vst [vmem:[%s1882_s12 + $0x88] sm:$0xff] %v1075_v42  ;;  %v1079_v44 = vld [vmem:[%s1886_s15 + $0x98] sm:$0xff]  ;;  %v1081_v45 = vld [vmem:[%s1886_s15 + $0xa0] sm:$0xff] }
 0x346   : >> { %1078 = vst [vmem:[%s1882_s12 + $0x90] sm:$0xff] %v1077_v43  ;;  %1080 = vst [vmem:[%s1882_s12 + $0x98] sm:$0xff] %v1079_v44  ;;  %v1083_v46 = vld [vmem:[%s1886_s15 + $0xa8] sm:$0xff]  ;;  %v1085_v47 = vld [vmem:[%s1886_s15 + $0xb0] sm:$0xff] }
 0x347   : >> { %1082 = vst [vmem:[%s1882_s12 + $0xa0] sm:$0xff] %v1081_v45  ;;  %v1087_v48 = vld [vmem:[%s1886_s15 + $0xb8] sm:$0xff]  ;;  %1084 = vst [vmem:[%s1882_s12 + $0xa8] sm:$0xff] %v1083_v46  ;;  %v1089_v49 = vld [vmem:[%s1886_s15 + $0xc0] sm:$0xff] }
 0x348   : >> { %1086 = vst [vmem:[%s1882_s12 + $0xb0] sm:$0xff] %v1085_v47  ;;  %1088 = vst [vmem:[%s1882_s12 + $0xb8] sm:$0xff] %v1087_v48  ;;  %v1091_v50 = vld [vmem:[%s1886_s15 + $0xc8] sm:$0xff]  ;;  %v1093_v51 = vld [vmem:[%s1886_s15 + $0xd0] sm:$0xff] }
 0x349   : >> { %1090 = vst [vmem:[%s1882_s12 + $0xc0] sm:$0xff] %v1089_v49  ;;  %1092 = vst [vmem:[%s1882_s12 + $0xc8] sm:$0xff] %v1091_v50  ;;  %v1095_v52 = vld [vmem:[%s1886_s15 + $0xd8] sm:$0xff]  ;;  %v1097_v53 = vld [vmem:[%s1886_s15 + $0xe0] sm:$0xff] }
 0x34a   : >> { %1094 = vst [vmem:[%s1882_s12 + $0xd0] sm:$0xff] %v1093_v51  ;;  %v1099_v37 = vld [vmem:[%s1886_s15 + $0xe8] sm:$0xff]  ;;  %1096 = vst [vmem:[%s1882_s12 + $0xd8] sm:$0xff] %v1095_v52  ;;  %v1101_v54 = vld [vmem:[%s1886_s15 + $0xf0] sm:$0xff] }
 0x34b   : >> { %1098 = vst [vmem:[%s1882_s12 + $0xe0] sm:$0xff] %v1097_v53  ;;  %1100 = vst [vmem:[%s1882_s12 + $0xe8] sm:$0xff] %v1099_v37  ;;  %v1103_v55 = vld [vmem:[%s1886_s15 + $0xf8] sm:$0xff]  ;;  %v1105_v56 = vld [vmem:[%s1886_s15 + $0x100] sm:$0xff] }
 0x34c   : >> { %1102 = vst [vmem:[%s1882_s12 + $0xf0] sm:$0xff] %v1101_v54  ;;  %1104 = vst [vmem:[%s1882_s12 + $0xf8] sm:$0xff] %v1103_v55  ;;  %v1107_v57 = vld [vmem:[%s1886_s15 + $0x108] sm:$0xff]  ;;  %v1109_v58 = vld [vmem:[%s1886_s15 + $0x110] sm:$0xff] }
 0x34d   : >> { %1106 = vst [vmem:[%s1882_s12 + $0x100] sm:$0xff] %v1105_v56  ;;  %v1111_v59 = vld [vmem:[%s1886_s15 + $0x118] sm:$0xff]  ;;  %1108 = vst [vmem:[%s1882_s12 + $0x108] sm:$0xff] %v1107_v57  ;;  %v1113_v60 = vld [vmem:[%s1886_s15 + $0x120] sm:$0xff] }
 0x34e   : >> { %1110 = vst [vmem:[%s1882_s12 + $0x110] sm:$0xff] %v1109_v58  ;;  %1112 = vst [vmem:[%s1882_s12 + $0x118] sm:$0xff] %v1111_v59  ;;  %v1115_v0 = vld [vmem:[%s1886_s15 + $0x128] sm:$0xff]  ;;  %v1117_v63 = vld [vmem:[%s1886_s15 + $0x130] sm:$0xff] }
 0x34f   : >> { %1114 = vst [vmem:[%s1882_s12 + $0x120] sm:$0xff] %v1113_v60  ;;  %1116 = vst [vmem:[%s1882_s12 + $0x128] sm:$0xff] %v1115_v0  ;;  %v1119_v6 = vld [vmem:[%s1886_s15 + $0x138] sm:$0xff]  ;;  %v1121_v9 = vld [vmem:[%s1886_s15 + $0x140] sm:$0xff] }
 0x350   : >> { %1118 = vst [vmem:[%s1882_s12 + $0x130] sm:$0xff] %v1117_v63  ;;  %v1123_v2 = vld [vmem:[%s1886_s15 + $0x148] sm:$0xff]  ;;  %1120 = vst [vmem:[%s1882_s12 + $0x138] sm:$0xff] %v1119_v6  ;;  %v1125_v12 = vld [vmem:[%s1886_s15 + $0x150] sm:$0xff] }
 0x351   : >> { %1122 = vst [vmem:[%s1882_s12 + $0x140] sm:$0xff] %v1121_v9  ;;  %1124 = vst [vmem:[%s1882_s12 + $0x148] sm:$0xff] %v1123_v2  ;;  %v1127_v61 = vld [vmem:[%s1886_s15 + $0x158] sm:$0xff]  ;;  %v1129_v20 = vld [vmem:[%s1886_s15 + $0x160] sm:$0xff] }
 0x352   : >> { %1126 = vst [vmem:[%s1882_s12 + $0x150] sm:$0xff] %v1125_v12  ;;  %1128 = vst [vmem:[%s1882_s12 + $0x158] sm:$0xff] %v1127_v61  ;;  %v1131_v62 = vld [vmem:[%s1886_s15 + $0x168] sm:$0xff]  ;;  %v1133_v22 = vld [vmem:[%s1886_s15 + $0x170] sm:$0xff] }
 0x353   : >> { %1130 = vst [vmem:[%s1882_s12 + $0x160] sm:$0xff] %v1129_v20  ;;  %v1135_v3 = vld [vmem:[%s1886_s15 + $0x178] sm:$0xff]  ;;  %1132 = vst [vmem:[%s1882_s12 + $0x168] sm:$0xff] %v1131_v62  ;;  %v1137_v27 = vld [vmem:[%s1886_s15 + $0x180] sm:$0xff] }
 0x354   : >> { %1134 = vst [vmem:[%s1882_s12 + $0x170] sm:$0xff] %v1133_v22  ;;  %1136 = vst [vmem:[%s1882_s12 + $0x178] sm:$0xff] %v1135_v3  ;;  %v1139_v4 = vld [vmem:[%s1886_s15 + $0x188] sm:$0xff]  ;;  %v1141_v29 = vld [vmem:[%s1886_s15 + $0x190] sm:$0xff] }
 0x355   : >> { %1138 = vst [vmem:[%s1882_s12 + $0x180] sm:$0xff] %v1137_v27  ;;  %1140 = vst [vmem:[%s1882_s12 + $0x188] sm:$0xff] %v1139_v4  ;;  %v1143_v5 = vld [vmem:[%s1886_s15 + $0x198] sm:$0xff]  ;;  %v1145_v32 = vld [vmem:[%s1886_s15 + $0x1a0] sm:$0xff] }
 0x356   : >> { %1142 = vst [vmem:[%s1882_s12 + $0x190] sm:$0xff] %v1141_v29  ;;  %v1147_v7 = vld [vmem:[%s1886_s15 + $0x1a8] sm:$0xff]  ;;  %1144 = vst [vmem:[%s1882_s12 + $0x198] sm:$0xff] %v1143_v5  ;;  %v1149_v8 = vld [vmem:[%s1886_s15 + $0x1b0] sm:$0xff] }
 0x357   : >> { %1146 = vst [vmem:[%s1882_s12 + $0x1a0] sm:$0xff] %v1145_v32  ;;  %1148 = vst [vmem:[%s1882_s12 + $0x1a8] sm:$0xff] %v1147_v7  ;;  %v1151_v10 = vld [vmem:[%s1886_s15 + $0x1b8] sm:$0xff]  ;;  %v1153_v11 = vld [vmem:[%s1886_s15 + $0x1c0] sm:$0xff] }
 0x358   : >> { %1150 = vst [vmem:[%s1882_s12 + $0x1b0] sm:$0xff] %v1149_v8  ;;  %1152 = vst [vmem:[%s1882_s12 + $0x1b8] sm:$0xff] %v1151_v10  ;;  %v1155_v13 = vld [vmem:[%s1886_s15 + $0x1c8] sm:$0xff]  ;;  %v1157_v14 = vld [vmem:[%s1886_s15 + $0x1d0] sm:$0xff]  ;;  %1037 = sbr.rel (!%p1034_p1) target bundleno = 828 (0x33c), region = 166 }
 0x359   : >> { %1154 = vst [vmem:[%s1882_s12 + $0x1c0] sm:$0xff] %v1153_v11  ;;  %v1159_v15 = vld [vmem:[%s1886_s15 + $0x1d8] sm:$0xff]  ;;  %1156 = vst [vmem:[%s1882_s12 + $0x1c8] sm:$0xff] %v1155_v13  ;;  %v1161_v16 = vld [vmem:[%s1886_s15 + $0x1e0] sm:$0xff] }
 0x35a   : >> { %1158 = vst [vmem:[%s1882_s12 + $0x1d0] sm:$0xff] %v1157_v14  ;;  %1160 = vst [vmem:[%s1882_s12 + $0x1d8] sm:$0xff] %v1159_v15  ;;  %v1163_v17 = vld [vmem:[%s1886_s15 + $0x1e8] sm:$0xff]  ;;  %v1165_v18 = vld [vmem:[%s1886_s15 + $0x1f0] sm:$0xff] }
 0x35b   : >> { %1162 = vst [vmem:[%s1882_s12 + $0x1e0] sm:$0xff] %v1161_v16  ;;  %1164 = vst [vmem:[%s1882_s12 + $0x1e8] sm:$0xff] %v1163_v17  ;;  %v1167_v19 = vld [vmem:[%s1886_s15 + $0x1f8] sm:$0xff]  ;;  %s2706_s15 = smov %s2358_s20 }
 0x35c   : >> { %1166 = vst [vmem:[%s1882_s12 + $0x1f0] sm:$0xff] %v1165_v18  ;;  %1168 = vst [vmem:[%s1882_s12 + $0x1f8] sm:$0xff] %v1167_v19  ;;  %s2705_s12 = smov %s2361_s21 }
 0x35d PF: > { %s2467_s22 = sand.u32 63, %s1028_s7   ;;  %s1590_s23 = sshll.u32 %s2291_s11, 13 }
 0x35e   : > { %s1180_s25 = sshra.s32 %s1590_s23, 4  ;;  %p1573_p2 = scmp.le.s32.totalorder %s2467_s22, 0 }
 0x35f   : > { %s1181_s26 = scalar_lea.vmem %s2268_s24, %s1180_s25 [#allocation3]   ;;  %s1184_s27 = scalar_lea.vmem %s2277_s28, %s1180_s25  }
 0x360   : > { %1478 = sbr.rel (%p1573_p2) target bundleno = 877 (0x36d), region = 171  ;;  %s1896_s9 = smov (!%p1573_p2), %s1184_s27  }
 0x361   : > { %s1900_s18 = smov (!%p1573_p2), %s1181_s26   ;;  %s1904_s19 = smov (!%p1573_p2), 0  }
 0x362   : > { %s1908_s17 = smov (!%p1573_p2), 0  }
 0x365 LB: >> { %v1196_v21 = vld [vmem:[%s1902_s18] sm:$0xff]  ;;  %s1198_s7 = sadd.s32 1, %s1906_s19  ;;  %s1190_s17 = sadd.s32 1, %s1910_s17   ;;  %s1910_s17 = sphi %s1908_s17, %s1190_s17   ;;  %s1906_s19 = sphi %s1904_s19, %s1905_s19   ;;  %s1902_s18 = sphi %s1900_s18, %s1203_s18   ;;  %s1898_s9 = sphi %s1896_s9, %s1204_s9  }
 0x366   : >> { %1197 = vst [vmem:[%s1898_s9] sm:$0xff] %v1196_v21  ;;  %p1199_p3 = scmp.ge.s32.totalorder %s1198_s7, %s2467_s22  ;;  %p1189_p4 = scmp.ge.s32.totalorder %s1190_s17, %s2467_s22 }
 0x368   : >> { %s2724_s7 = smov (%p1199_p3, %s1198_s7), 0  ;;  %1192 = sbr.rel (!%p1189_p4) target bundleno = 869 (0x365), region = 177 }
 0x369   : >> { %s1574_s11 = sshll.u32 %s2724_s7, 3  ;;  %s1905_s19 = smov %s2724_s7  }
 0x36a   : >> { %s1203_s18 = scalar_lea.vmem %s1181_s26, %s1574_s11 [#allocation3]   ;;  %s1204_s9 = scalar_lea.vmem %s1184_s27, %s1574_s11  }
 0x36d PF: > { %1207 = sbr.rel (%p1024_p11) target bundleno = 941 (0x3ad), region = 97  ;;  %s2479_s12 = ssub.s32 (!%p1024_p11), %s2720_s29, %s2284_s14 }
 0x36e   : > { %s1213_s15 = sshrl.u32 (!%p1024_p11), %s2720_s29, 3  ;;  %s1210_s16 = scalar_lea.vmem (!%p1024_p11), %s2268_s24, %s2479_s12 [#allocation3] }
 0x36f   : > { %s2488_s21 = sshrl.u32 (!%p1024_p11), %s1213_s15, 6 }
 0x370   : > { %p1576_p5 = scmp.le.s32.totalorder (!%p1024_p11), %s2488_s21, 0 }
 0x372   : > { %1492 = sbr.rel (%p1576_p5) target bundleno = 920 (0x398), region = 182  ;;  %s2708_s22 = smov (!%p1576_p5), %s2277_s28 }
 0x373   : > { %s2709_s23 = smov (!%p1576_p5), %s2268_s24  ;;  %s2497_s25 = smov (!%p1576_p5), 0  }
 0x374   : > { %s2499_s26 = smov (!%p1576_p5), 0  }
 0x377 LB: >> { %v1226_v1 = vld [vmem:[%s1918_s23] sm:$0xff]  ;;  %v1228_v23 = vld [vmem:[%s1918_s23 + $0x8] sm:$0xff]  ;;  %v1230_v24 = vld [vmem:[%s1918_s23 + $0x10] sm:$0xff]  ;;  %s1354_s27 = sadd.s32 1, %s1922_s25  ;;  %s1220_s26 = sadd.s32 1, %s1926_s26   ;;  %s1926_s26 = sphi %s2499_s26, %s1220_s26   ;;  %s1922_s25 = sphi %s2497_s25, %s2712_s25   ;;  %s1918_s23 = sphi %s2709_s23, %s2711_s23   ;;  %s1914_s22 = sphi %s2708_s22, %s2710_s22  }
 0x378   : >> { %1227 = vst [vmem:[%s1914_s22] sm:$0xff] %v1226_v1  ;;  %1229 = vst [vmem:[%s1914_s22 + $0x8] sm:$0xff] %v1228_v23  ;;  %v1232_v25 = vld [vmem:[%s1918_s23 + $0x18] sm:$0xff]  ;;  %v1234_v26 = vld [vmem:[%s1918_s23 + $0x20] sm:$0xff]  ;;  %p1355_p6 = scmp.ge.s32.totalorder %s1354_s27, %s2488_s21  ;;  %p1219_p7 = scmp.ge.s32.totalorder %s1220_s26, %s2488_s21 }
 0x379   : >> { %1231 = vst [vmem:[%s1914_s22 + $0x10] sm:$0xff] %v1230_v24  ;;  %v1236_v28 = vld [vmem:[%s1918_s23 + $0x28] sm:$0xff]  ;;  %1233 = vst [vmem:[%s1914_s22 + $0x18] sm:$0xff] %v1232_v25  ;;  %v1238_v30 = vld [vmem:[%s1918_s23 + $0x30] sm:$0xff] }
 0x37a   : >> { %1235 = vst [vmem:[%s1914_s22 + $0x20] sm:$0xff] %v1234_v26  ;;  %1237 = vst [vmem:[%s1914_s22 + $0x28] sm:$0xff] %v1236_v28  ;;  %v1240_v31 = vld [vmem:[%s1918_s23 + $0x38] sm:$0xff]  ;;  %v1242_v33 = vld [vmem:[%s1918_s23 + $0x40] sm:$0xff]  ;;  %s2726_s27 = smov (%p1355_p6, %s1354_s27), 0 }
 0x37b   : >> { %1239 = vst [vmem:[%s1914_s22 + $0x30] sm:$0xff] %v1238_v30  ;;  %1241 = vst [vmem:[%s1914_s22 + $0x38] sm:$0xff] %v1240_v31  ;;  %v1244_v34 = vld [vmem:[%s1918_s23 + $0x48] sm:$0xff]  ;;  %v1246_v35 = vld [vmem:[%s1918_s23 + $0x50] sm:$0xff]  ;;  %s1577_s9 = sshll.u32 %s2726_s27, 9  ;;  %s2712_s25 = smov %s2726_s27 }
 0x37c   : >> { %1243 = vst [vmem:[%s1914_s22 + $0x40] sm:$0xff] %v1242_v33  ;;  %v1248_v36 = vld [vmem:[%s1918_s23 + $0x58] sm:$0xff]  ;;  %1245 = vst [vmem:[%s1914_s22 + $0x48] sm:$0xff] %v1244_v34  ;;  %v1250_v38 = vld [vmem:[%s1918_s23 + $0x60] sm:$0xff]  ;;  %s2555_s18 = scalar_lea.vmem %s2268_s24, %s1577_s9 [#allocation3]   ;;  %s2558_s19 = scalar_lea.vmem %s2277_s28, %s1577_s9  }
 0x37d   : >> { %1247 = vst [vmem:[%s1914_s22 + $0x50] sm:$0xff] %v1246_v35  ;;  %1249 = vst [vmem:[%s1914_s22 + $0x58] sm:$0xff] %v1248_v36  ;;  %v1252_v39 = vld [vmem:[%s1918_s23 + $0x68] sm:$0xff]  ;;  %v1254_v40 = vld [vmem:[%s1918_s23 + $0x70] sm:$0xff] }
 0x37e   : >> { %1251 = vst [vmem:[%s1914_s22 + $0x60] sm:$0xff] %v1250_v38  ;;  %1253 = vst [vmem:[%s1914_s22 + $0x68] sm:$0xff] %v1252_v39  ;;  %v1256_v41 = vld [vmem:[%s1918_s23 + $0x78] sm:$0xff]  ;;  %v1258_v42 = vld [vmem:[%s1918_s23 + $0x80] sm:$0xff] }
 0x37f   : >> { %1255 = vst [vmem:[%s1914_s22 + $0x70] sm:$0xff] %v1254_v40  ;;  %v1260_v43 = vld [vmem:[%s1918_s23 + $0x88] sm:$0xff]  ;;  %1257 = vst [vmem:[%s1914_s22 + $0x78] sm:$0xff] %v1256_v41  ;;  %v1262_v44 = vld [vmem:[%s1918_s23 + $0x90] sm:$0xff] }
 0x380   : >> { %1259 = vst [vmem:[%s1914_s22 + $0x80] sm:$0xff] %v1258_v42  ;;  %1261 = vst [vmem:[%s1914_s22 + $0x88] sm:$0xff] %v1260_v43  ;;  %v1264_v45 = vld [vmem:[%s1918_s23 + $0x98] sm:$0xff]  ;;  %v1266_v46 = vld [vmem:[%s1918_s23 + $0xa0] sm:$0xff] }
 0x381   : >> { %1263 = vst [vmem:[%s1914_s22 + $0x90] sm:$0xff] %v1262_v44  ;;  %1265 = vst [vmem:[%s1914_s22 + $0x98] sm:$0xff] %v1264_v45  ;;  %v1268_v47 = vld [vmem:[%s1918_s23 + $0xa8] sm:$0xff]  ;;  %v1270_v48 = vld [vmem:[%s1918_s23 + $0xb0] sm:$0xff] }
 0x382   : >> { %1267 = vst [vmem:[%s1914_s22 + $0xa0] sm:$0xff] %v1266_v46  ;;  %v1272_v49 = vld [vmem:[%s1918_s23 + $0xb8] sm:$0xff]  ;;  %1269 = vst [vmem:[%s1914_s22 + $0xa8] sm:$0xff] %v1268_v47  ;;  %v1274_v50 = vld [vmem:[%s1918_s23 + $0xc0] sm:$0xff] }
 0x383   : >> { %1271 = vst [vmem:[%s1914_s22 + $0xb0] sm:$0xff] %v1270_v48  ;;  %1273 = vst [vmem:[%s1914_s22 + $0xb8] sm:$0xff] %v1272_v49  ;;  %v1276_v51 = vld [vmem:[%s1918_s23 + $0xc8] sm:$0xff]  ;;  %v1278_v52 = vld [vmem:[%s1918_s23 + $0xd0] sm:$0xff] }
 0x384   : >> { %1275 = vst [vmem:[%s1914_s22 + $0xc0] sm:$0xff] %v1274_v50  ;;  %1277 = vst [vmem:[%s1914_s22 + $0xc8] sm:$0xff] %v1276_v51  ;;  %v1280_v53 = vld [vmem:[%s1918_s23 + $0xd8] sm:$0xff]  ;;  %v1282_v37 = vld [vmem:[%s1918_s23 + $0xe0] sm:$0xff] }
 0x385   : >> { %1279 = vst [vmem:[%s1914_s22 + $0xd0] sm:$0xff] %v1278_v52  ;;  %v1284_v54 = vld [vmem:[%s1918_s23 + $0xe8] sm:$0xff]  ;;  %1281 = vst [vmem:[%s1914_s22 + $0xd8] sm:$0xff] %v1280_v53  ;;  %v1286_v55 = vld [vmem:[%s1918_s23 + $0xf0] sm:$0xff] }
 0x386   : >> { %1283 = vst [vmem:[%s1914_s22 + $0xe0] sm:$0xff] %v1282_v37  ;;  %1285 = vst [vmem:[%s1914_s22 + $0xe8] sm:$0xff] %v1284_v54  ;;  %v1288_v56 = vld [vmem:[%s1918_s23 + $0xf8] sm:$0xff]  ;;  %v1290_v57 = vld [vmem:[%s1918_s23 + $0x100] sm:$0xff] }
 0x387   : >> { %1287 = vst [vmem:[%s1914_s22 + $0xf0] sm:$0xff] %v1286_v55  ;;  %1289 = vst [vmem:[%s1914_s22 + $0xf8] sm:$0xff] %v1288_v56  ;;  %v1292_v58 = vld [vmem:[%s1918_s23 + $0x108] sm:$0xff]  ;;  %v1294_v59 = vld [vmem:[%s1918_s23 + $0x110] sm:$0xff] }
 0x388   : >> { %1291 = vst [vmem:[%s1914_s22 + $0x100] sm:$0xff] %v1290_v57  ;;  %v1296_v60 = vld [vmem:[%s1918_s23 + $0x118] sm:$0xff]  ;;  %1293 = vst [vmem:[%s1914_s22 + $0x108] sm:$0xff] %v1292_v58  ;;  %v1298_v0 = vld [vmem:[%s1918_s23 + $0x120] sm:$0xff] }
 0x389   : >> { %1295 = vst [vmem:[%s1914_s22 + $0x110] sm:$0xff] %v1294_v59  ;;  %1297 = vst [vmem:[%s1914_s22 + $0x118] sm:$0xff] %v1296_v60  ;;  %v1300_v63 = vld [vmem:[%s1918_s23 + $0x128] sm:$0xff]  ;;  %v1302_v6 = vld [vmem:[%s1918_s23 + $0x130] sm:$0xff] }
 0x38a   : >> { %1299 = vst [vmem:[%s1914_s22 + $0x120] sm:$0xff] %v1298_v0  ;;  %1301 = vst [vmem:[%s1914_s22 + $0x128] sm:$0xff] %v1300_v63  ;;  %v1304_v9 = vld [vmem:[%s1918_s23 + $0x138] sm:$0xff]  ;;  %v1306_v2 = vld [vmem:[%s1918_s23 + $0x140] sm:$0xff] }
 0x38b   : >> { %1303 = vst [vmem:[%s1914_s22 + $0x130] sm:$0xff] %v1302_v6  ;;  %v1308_v12 = vld [vmem:[%s1918_s23 + $0x148] sm:$0xff]  ;;  %1305 = vst [vmem:[%s1914_s22 + $0x138] sm:$0xff] %v1304_v9  ;;  %v1310_v61 = vld [vmem:[%s1918_s23 + $0x150] sm:$0xff] }
 0x38c   : >> { %1307 = vst [vmem:[%s1914_s22 + $0x140] sm:$0xff] %v1306_v2  ;;  %1309 = vst [vmem:[%s1914_s22 + $0x148] sm:$0xff] %v1308_v12  ;;  %v1312_v20 = vld [vmem:[%s1918_s23 + $0x158] sm:$0xff]  ;;  %v1314_v62 = vld [vmem:[%s1918_s23 + $0x160] sm:$0xff] }
 0x38d   : >> { %1311 = vst [vmem:[%s1914_s22 + $0x150] sm:$0xff] %v1310_v61  ;;  %1313 = vst [vmem:[%s1914_s22 + $0x158] sm:$0xff] %v1312_v20  ;;  %v1316_v22 = vld [vmem:[%s1918_s23 + $0x168] sm:$0xff]  ;;  %v1318_v3 = vld [vmem:[%s1918_s23 + $0x170] sm:$0xff] }
 0x38e   : >> { %1315 = vst [vmem:[%s1914_s22 + $0x160] sm:$0xff] %v1314_v62  ;;  %v1320_v27 = vld [vmem:[%s1918_s23 + $0x178] sm:$0xff]  ;;  %1317 = vst [vmem:[%s1914_s22 + $0x168] sm:$0xff] %v1316_v22  ;;  %v1322_v4 = vld [vmem:[%s1918_s23 + $0x180] sm:$0xff] }
 0x38f   : >> { %1319 = vst [vmem:[%s1914_s22 + $0x170] sm:$0xff] %v1318_v3  ;;  %1321 = vst [vmem:[%s1914_s22 + $0x178] sm:$0xff] %v1320_v27  ;;  %v1324_v29 = vld [vmem:[%s1918_s23 + $0x188] sm:$0xff]  ;;  %v1326_v5 = vld [vmem:[%s1918_s23 + $0x190] sm:$0xff] }
 0x390   : >> { %1323 = vst [vmem:[%s1914_s22 + $0x180] sm:$0xff] %v1322_v4  ;;  %1325 = vst [vmem:[%s1914_s22 + $0x188] sm:$0xff] %v1324_v29  ;;  %v1328_v32 = vld [vmem:[%s1918_s23 + $0x198] sm:$0xff]  ;;  %v1330_v7 = vld [vmem:[%s1918_s23 + $0x1a0] sm:$0xff] }
 0x391   : >> { %1327 = vst [vmem:[%s1914_s22 + $0x190] sm:$0xff] %v1326_v5  ;;  %v1332_v8 = vld [vmem:[%s1918_s23 + $0x1a8] sm:$0xff]  ;;  %1329 = vst [vmem:[%s1914_s22 + $0x198] sm:$0xff] %v1328_v32  ;;  %v1334_v10 = vld [vmem:[%s1918_s23 + $0x1b0] sm:$0xff] }
 0x392   : >> { %1331 = vst [vmem:[%s1914_s22 + $0x1a0] sm:$0xff] %v1330_v7  ;;  %1333 = vst [vmem:[%s1914_s22 + $0x1a8] sm:$0xff] %v1332_v8  ;;  %v1336_v11 = vld [vmem:[%s1918_s23 + $0x1b8] sm:$0xff]  ;;  %v1338_v13 = vld [vmem:[%s1918_s23 + $0x1c0] sm:$0xff] }
 0x393   : >> { %1335 = vst [vmem:[%s1914_s22 + $0x1b0] sm:$0xff] %v1334_v10  ;;  %1337 = vst [vmem:[%s1914_s22 + $0x1b8] sm:$0xff] %v1336_v11  ;;  %v1340_v14 = vld [vmem:[%s1918_s23 + $0x1c8] sm:$0xff]  ;;  %v1342_v15 = vld [vmem:[%s1918_s23 + $0x1d0] sm:$0xff]  ;;  %1222 = sbr.rel (!%p1219_p7) target bundleno = 887 (0x377), region = 188 }
 0x394   : >> { %1339 = vst [vmem:[%s1914_s22 + $0x1c0] sm:$0xff] %v1338_v13  ;;  %v1344_v16 = vld [vmem:[%s1918_s23 + $0x1d8] sm:$0xff]  ;;  %1341 = vst [vmem:[%s1914_s22 + $0x1c8] sm:$0xff] %v1340_v14  ;;  %v1346_v17 = vld [vmem:[%s1918_s23 + $0x1e0] sm:$0xff] }
 0x395   : >> { %1343 = vst [vmem:[%s1914_s22 + $0x1d0] sm:$0xff] %v1342_v15  ;;  %1345 = vst [vmem:[%s1914_s22 + $0x1d8] sm:$0xff] %v1344_v16  ;;  %v1348_v18 = vld [vmem:[%s1918_s23 + $0x1e8] sm:$0xff]  ;;  %v1350_v19 = vld [vmem:[%s1918_s23 + $0x1f0] sm:$0xff] }
 0x396   : >> { %1347 = vst [vmem:[%s1914_s22 + $0x1e0] sm:$0xff] %v1346_v17  ;;  %1349 = vst [vmem:[%s1914_s22 + $0x1e8] sm:$0xff] %v1348_v18  ;;  %v1352_v21 = vld [vmem:[%s1918_s23 + $0x1f8] sm:$0xff]  ;;  %s2711_s23 = smov %s2555_s18 }
 0x397   : >> { %1351 = vst [vmem:[%s1914_s22 + $0x1f0] sm:$0xff] %v1350_v19  ;;  %1353 = vst [vmem:[%s1914_s22 + $0x1f8] sm:$0xff] %v1352_v21  ;;  %s2710_s22 = smov %s2558_s19 }
 0x398 PF: > { %s2664_s17 = sand.u32 63, %s1213_s15   ;;  %s1592_s7 = sshll.u32 %s2488_s21, 13 }
 0x399   : > { %s1365_s11 = sshra.s32 %s1592_s7, 4  ;;  %p1582_p8 = scmp.le.s32.totalorder %s2664_s17, 0 }
 0x39a   : > { %s1366_s9 = scalar_lea.vmem %s2268_s24, %s1365_s11 [#allocation3]   ;;  %s1369_s20 = scalar_lea.vmem %s2277_s28, %s1365_s11  }
 0x39b   : > { %1506 = sbr.rel (%p1582_p8) target bundleno = 936 (0x3a8), region = 193  ;;  %s1928_s18 = smov (!%p1582_p8), %s1369_s20  }
 0x39c   : > { %s1932_s27 = smov (!%p1582_p8), %s1366_s9   ;;  %s1936_s19 = smov (!%p1582_p8), 0  }
 0x39d   : > { %s1940_s26 = smov (!%p1582_p8), 0  }
 0x3a0 LB: >> { %v1381_v1 = vld [vmem:[%s1934_s27] sm:$0xff]  ;;  %s1383_s15 = sadd.s32 1, %s1938_s19  ;;  %s1375_s26 = sadd.s32 1, %s1942_s26   ;;  %s1942_s26 = sphi %s1940_s26, %s1375_s26   ;;  %s1938_s19 = sphi %s1936_s19, %s1937_s19   ;;  %s1934_s27 = sphi %s1932_s27, %s1388_s27   ;;  %s1930_s18 = sphi %s1928_s18, %s1389_s18  }
 0x3a1   : >> { %1382 = vst [vmem:[%s1930_s18] sm:$0xff] %v1381_v1  ;;  %p1384_p9 = scmp.ge.s32.totalorder %s1383_s15, %s2664_s17  ;;  %p1374_p10 = scmp.ge.s32.totalorder %s1375_s26, %s2664_s17 }
 0x3a3   : >> { %s2728_s15 = smov (%p1384_p9, %s1383_s15), 0  ;;  %1377 = sbr.rel (!%p1374_p10) target bundleno = 928 (0x3a0), region = 199 }
 0x3a4   : >> { %s1583_s21 = sshll.u32 %s2728_s15, 3  ;;  %s1937_s19 = smov %s2728_s15  }
 0x3a5   : >> { %s1388_s27 = scalar_lea.vmem %s1366_s9, %s1583_s21 [#allocation3]   ;;  %s1389_s18 = scalar_lea.vmem %s1369_s20, %s1583_s21  }
 0x3a8 PF: > { %s1946_s22 = smov 1   ;;  %s2713_s7 = scalar_lea.vmem %s2277_s28, %s2479_s12 }
 0x3a9   : > { %s1390_s23 = sshll.u32 %s1946_s22, %s2284_s14 }
 0x3aa   : > { %s1585_s25 = sadd.s32 4294967295, %s1390_s23 }
 0x3ab   : > { %v1400_v23 = vld [vmem:[%s1210_s16] sm:%s1585_s25] }
 0x3ac   : > { %1401 = vst [vmem:[%s2713_s7] sm:%s1585_s25] %v1400_v23 }
 0x3ad PF: > { %p1586_p11 = scmp.ge.u32.totalorder %s2720_s29, 8 }
 0x3ae   : > { %s1947_s11 = smov (!%p1586_p11), 1  }
 0x3af   : > { %1010 = sbr.rel (%p1586_p11) target bundleno = 950 (0x3b6), region = 68  ;;  %s1011_s20 = sshll.u32 (!%p1586_p11), %s1947_s11, %s2720_s29 }
 0x3b0   : > { %s1587_s17 = sadd.s32 (!%p1586_p11), 4294967295, %s1011_s20 }
 0x3b4   : > { %v1021_v24 = vld [vmem:[%s2268_s24] sm:%s1587_s17] }
 0x3b5   : > { %1022 = vst [vmem:[%s2277_s28] sm:%s1587_s17] %v1021_v24 }
 0x3b6 PF: > { %p17_p12 = scmp.ge.s32.totalorder %s2011_s10, 4   ;;  %s2714_s29 = smov %s1874_s30 }
 0x3b7   : > { %s2715_s30 = smov %s2019_s13  ;;  %s2716_s9 = smov %s2011_s10 }
 0x3b8   :  { %19 = sbr.rel (!%p17_p12) target bundleno = 5 (0x5), region = 210 }

</bundles_post_ra>
